<compile_context>
chip_gen: v7x
topology: tpu7x:2x2x1
jax: 0.10.0
libtpu: 0.0.40
codegen_flags: <defaults>
</compile_context>

<pallas_src>
import functools

import jax
import jax.numpy as jnp
from jax.experimental import pallas as pl
from jax.experimental.pallas import tpu as pltpu


def _round_up(n, m):
    return ((n + m - 1) // m) * m


def _pick_batch_tile(B, Dp):
    """Batch tile: multiple of 8 sublanes, ~1 MiB of f32 activations, <=1024."""
    rows = (1 << 20) // (Dp * 4)
    rows = (rows // 8) * 8
    rows = max(8, min(rows, 1024))
    rows = min(rows, _round_up(B, 8))
    return _round_up(rows, 8)


def _dcnv2_kernel(x0_ref, w_ref, b_ref, out_ref, *, num_layers):
    """One batch tile of the full DCNv2 stack.

    x0_ref:  (TB, Dp)     base features (zero-padded to Dp lanes)
    w_ref:   (L, Dp, Dp)  per-layer W^T with diag_scale*I folded in (compute dtype)
    b_ref:   (L, 1, Dp)   per-layer bias, f32
    out_ref: (TB, Dp)
    """
    x0 = x0_ref[...].astype(jnp.float32)
    xl = x0
    for l in range(num_layers):          # static unroll; L is small
        w = w_ref[l]                     # (Dp, Dp) compute dtype (bf16 default)
        b = b_ref[l]                     # (1, Dp) f32, broadcasts over batch
        # MXU matmul with f32 accumulation; diag_scale already folded into w.
        prod = jnp.dot(xl.astype(w.dtype), w,
                       preferred_element_type=jnp.float32) + b
        # Fused elementwise cross update on the VPU (f32).
        xl = x0 * prod + xl
    out_ref[...] = xl.astype(out_ref.dtype)


def dcnv2_forward(x, weights_t, biases, *, diag_scale=0.0, batch_tile=None,
                  compute_dtype=jnp.bfloat16):
    """Run the DCNv2 forward pass.

    x:         (B, D)
    weights_t: (L, D, D)  -- W^T per layer (y = x @ weights_t[l] + biases[l])
    biases:    (L, 1, D)
    compute_dtype: dtype fed to the MXU (accumulation is always f32).
    """
    B, D = x.shape
    L = weights_t.shape[0]

    # Fold diag_scale into the weights: x @ (W^T + s*I) == x @ W^T + s*x.
    if diag_scale:
        weights_t = weights_t + diag_scale * jnp.eye(D, dtype=weights_t.dtype)[None]

    # Pad the feature dim to a lane-dense multiple of 128.  Zero padding is
    # exact: padded columns/rows of W'/b are zero, so padded lanes stay zero.
    Dp = _round_up(max(D, 128), 128)

    if batch_tile is None:
        tb = _pick_batch_tile(B, Dp)
    else:
        tb = _round_up(batch_tile, 8)
    Bp = _round_up(B, tb)

    x_p = jnp.pad(x, ((0, Bp - B), (0, Dp - D)))
    w_p = jnp.pad(weights_t, ((0, 0), (0, Dp - D), (0, Dp - D))).astype(compute_dtype)
    b_p = jnp.pad(biases, ((0, 0), (0, 0), (0, Dp - D))).astype(jnp.float32)

    kernel = functools.partial(_dcnv2_kernel, num_layers=L)

    # VMEM budget: resident weights/biases (x2 in case they end up
    # double-buffered), double-buffered x/out tiles, in-kernel f32 temporaries
    # and fixed headroom.  Never below 32 MiB; capped at 64 MiB (v7x VMEM).
    wbytes = L * Dp * Dp * jnp.dtype(compute_dtype).itemsize
    bbytes = L * 8 * Dp * 4
    tile_bytes = 2 * 2 * tb * Dp * 4
    needed = 2 * (wbytes + bbytes) + 2 * tile_bytes + 4 * tb * Dp * 4 + (4 << 20)
    vmem_limit = int(min(max(needed, 32 << 20), 64 << 20))

    cost = pl.CostEstimate(
        flops=int(2 * L * Bp * Dp * Dp + 3 * L * Bp * Dp),
        transcendentals=0,
        bytes_accessed=int(2 * Bp * Dp * x.dtype.itemsize + wbytes + L * Dp * 4),
    )

    def _run(single_buffer_resident):
        if single_buffer_resident:
            # Weights/biases are grid-invariant; single-buffer them so only one
            # copy of the (L, Dp, Dp) slab is resident in VMEM.
            w_spec = pl.BlockSpec((L, Dp, Dp), lambda i: (0, 0, 0),
                                  pipeline_mode=pl.Buffered(1))
            b_spec = pl.BlockSpec((L, 1, Dp), lambda i: (0, 0, 0),
                                  pipeline_mode=pl.Buffered(1))
        else:
            w_spec = pl.BlockSpec((L, Dp, Dp), lambda i: (0, 0, 0))
            b_spec = pl.BlockSpec((L, 1, Dp), lambda i: (0, 0, 0))
        return pl.pallas_call(
            kernel,
            out_shape=jax.ShapeDtypeStruct((Bp, Dp), x.dtype),
            grid_spec=pltpu.PrefetchScalarGridSpec(
                num_scalar_prefetch=0,
                grid=(Bp // tb,),
                in_specs=[
                    pl.BlockSpec((tb, Dp), lambda i: (i, 0)),   # x0 tile
                    w_spec,                                     # all weights
                    b_spec,                                     # all biases
                ],
                out_specs=pl.BlockSpec((tb, Dp), lambda i: (i, 0)),
            ),
            compiler_params=pltpu.CompilerParams(
                dimension_semantics=("parallel",),
                vmem_limit_bytes=vmem_limit,
            ),
            cost_estimate=cost,
        )(x_p, w_p, b_p)

    try:
        out_p = _run(True)
    except Exception:
        # pipeline_mode / pl.Buffered(1) unsupported in this configuration:
        # fall back to default (double-buffered) resident weights.
        out_p = _run(False)

    return out_p[:B, :D]


def dcnv2_reference(x, weights_t, biases, diag_scale):
    """Pure-JAX f32 reference matching the PyTorch module semantics."""
    x0 = x.astype(jnp.float32)
    xl = x0
    for l in range(weights_t.shape[0]):
        prod = xl @ weights_t[l] + biases[l]
        if diag_scale:
            prod = prod + diag_scale * xl
        xl = x0 * prod + xl
    return xl.astype(x.dtype)


def init_params(key, num_layers, in_dim, use_bias=True):
    """Deterministic init mirroring torch.nn.Linear defaults U[-1/sqrt(d), 1/sqrt(d)].

    Returns weights_t: (L, D, D) already transposed to (in, out), biases: (L, 1, D).
    """
    bound = 1.0 / jnp.sqrt(jnp.float32(in_dim))
    w_list, b_list = [], []
    for _ in range(num_layers):
        key, kw, kb = jax.random.split(key, 3)
        w = jax.random.uniform(
            kw, (in_dim, in_dim), jnp.float32, minval=-bound, maxval=bound
        )  # torch weight shape is (out, in); store transposed (in, out)
        w_list.append(w.T)
        if use_bias:
            b = jax.random.uniform(
                kb, (1, in_dim), jnp.float32, minval=-bound, maxval=bound
            )
        else:
            b = jnp.zeros((1, in_dim), jnp.float32)
        b_list.append(b)
    return jnp.stack(w_list, axis=0), jnp.stack(b_list, axis=0)


if __name__ == "__main__":
    # Small shapes consistent with DCNv2(in_dim=32, num_layers=3, diag_scale=0.1)
    batch, in_dim, num_layers, diag_scale = 8, 32, 3, 0.1

    key = jax.random.PRNGKey(0)
    key, kx = jax.random.split(key)
    x = jax.random.normal(kx, (batch, in_dim), jnp.float32)
    weights_t, biases = init_params(key, num_layers, in_dim, use_bias=True)

    ref = dcnv2_reference(x, weights_t, biases, diag_scale)

    # f32 compute path: must match the f32 reference tightly (diag_scale fold
    # and zero padding are numerically exact up to matmul rounding).
    out_f32 = jax.block_until_ready(
        dcnv2_forward(x, weights_t, biases, diag_scale=diag_scale,
                      compute_dtype=jnp.float32))
    assert out_f32.shape == (batch, in_dim)
    assert jnp.allclose(out_f32, ref, atol=1e-4, rtol=1e-4), "f32 mismatch vs reference"

    # Default fast path: bf16 weights on the MXU with f32 accumulation.
    # Tolerance widened to cover bf16 rounding only.
    out = jax.block_until_ready(
        dcnv2_forward(x, weights_t, biases, diag_scale=diag_scale))
    assert out.shape == (batch, in_dim)
    assert jnp.allclose(out, ref, atol=5e-2, rtol=5e-2), "bf16 mismatch vs reference"

    print("KERNEL_OK")
</pallas_src>

<mosaic_0001>
module attributes {stable_mosaic.version = 11 : i64} {
  func.func @_dcnv2_kernel(%arg0: i32, %arg1: memref<8x128xf32, #tpu.memory_space<vmem>>, %arg2: memref<3x128x128xf32, #tpu.memory_space<vmem>>, %arg3: memref<3x1x128xf32, #tpu.memory_space<vmem>>, %arg4: memref<8x128xf32, #tpu.memory_space<vmem>>) attributes {dimension_semantics = [#tpu.dimension_semantics<parallel>], iteration_bounds = array<i64: 1>, scalar_prefetch = 0 : i64, scratch_operands = 0 : i64, tpu.core_type = #tpu.core_type<tc>, window_params = [{transform_indices = @transform_0, window_bounds = array<i64: 8, 128>}, {pipeline_mode = #tpu.pipeline_mode<synchronous>, transform_indices = @transform_1, window_bounds = array<i64: 3, 128, 128>}, {pipeline_mode = #tpu.pipeline_mode<synchronous>, transform_indices = @transform_2, window_bounds = array<i64: 3, 1, 128>}, {transform_indices = @transform_3, window_bounds = array<i64: 8, 128>}]} {
    %c0 = arith.constant 0 : index
    %c0_0 = arith.constant 0 : index
    %0 = vector.load %arg1[%c0, %c0_0] : memref<8x128xf32, #tpu.memory_space<vmem>>, vector<8x128xf32>
    %c0_1 = arith.constant 0 : index
    %c0_2 = arith.constant 0 : index
    %c0_3 = arith.constant 0 : index
    %1 = vector.load %arg2[%c0_1, %c0_2, %c0_3] : memref<3x128x128xf32, #tpu.memory_space<vmem>>, vector<1x128x128xf32>
    %2 = vector.shape_cast %1 : vector<1x128x128xf32> to vector<128x128xf32>
    %c0_4 = arith.constant 0 : index
    %c0_5 = arith.constant 0 : index
    %c0_6 = arith.constant 0 : index
    %3 = vector.load %arg3[%c0_4, %c0_5, %c0_6] : memref<3x1x128xf32, #tpu.memory_space<vmem>>, vector<1x1x128xf32>
    %4 = vector.shape_cast %3 : vector<1x1x128xf32> to vector<1x128xf32>
    %cst = arith.constant dense<0.000000e+00> : vector<8x128xf32>
    %5 = tpu.matmul %0, %2, %cst {dimension_numbers = #tpu.dot_dimension_numbers<[1], [0], [0], [1], [0, 0, 1, 1], [], []>} : vector<8x128xf32>, vector<128x128xf32>, vector<8x128xf32> -> vector<8x128xf32>
    %6 = vector.broadcast %4 : vector<1x128xf32> to vector<8x128xf32>
    %7 = arith.addf %5, %6 : vector<8x128xf32>
    %8 = arith.mulf %0, %7 : vector<8x128xf32>
    %9 = arith.addf %8, %0 : vector<8x128xf32>
    %c1 = arith.constant 1 : index
    %c0_7 = arith.constant 0 : index
    %c0_8 = arith.constant 0 : index
    %10 = vector.load %arg2[%c1, %c0_7, %c0_8] : memref<3x128x128xf32, #tpu.memory_space<vmem>>, vector<1x128x128xf32>
    %11 = vector.shape_cast %10 : vector<1x128x128xf32> to vector<128x128xf32>
    %c1_9 = arith.constant 1 : index
    %c0_10 = arith.constant 0 : index
    %c0_11 = arith.constant 0 : index
    %12 = vector.load %arg3[%c1_9, %c0_10, %c0_11] : memref<3x1x128xf32, #tpu.memory_space<vmem>>, vector<1x1x128xf32>
    %13 = vector.shape_cast %12 : vector<1x1x128xf32> to vector<1x128xf32>
    %cst_12 = arith.constant dense<0.000000e+00> : vector<8x128xf32>
    %14 = tpu.matmul %9, %11, %cst_12 {dimension_numbers = #tpu.dot_dimension_numbers<[1], [0], [0], [1], [0, 0, 1, 1], [], []>} : vector<8x128xf32>, vector<128x128xf32>, vector<8x128xf32> -> vector<8x128xf32>
    %15 = vector.broadcast %13 : vector<1x128xf32> to vector<8x128xf32>
    %16 = arith.addf %14, %15 : vector<8x128xf32>
    %17 = arith.mulf %0, %16 : vector<8x128xf32>
    %18 = arith.addf %17, %9 : vector<8x128xf32>
    %c2 = arith.constant 2 : index
    %c0_13 = arith.constant 0 : index
    %c0_14 = arith.constant 0 : index
    %19 = vector.load %arg2[%c2, %c0_13, %c0_14] : memref<3x128x128xf32, #tpu.memory_space<vmem>>, vector<1x128x128xf32>
    %20 = vector.shape_cast %19 : vector<1x128x128xf32> to vector<128x128xf32>
    %c2_15 = arith.constant 2 : index
    %c0_16 = arith.constant 0 : index
    %c0_17 = arith.constant 0 : index
    %21 = vector.load %arg3[%c2_15, %c0_16, %c0_17] : memref<3x1x128xf32, #tpu.memory_space<vmem>>, vector<1x1x128xf32>
    %22 = vector.shape_cast %21 : vector<1x1x128xf32> to vector<1x128xf32>
    %cst_18 = arith.constant dense<0.000000e+00> : vector<8x128xf32>
    %23 = tpu.matmul %18, %20, %cst_18 {dimension_numbers = #tpu.dot_dimension_numbers<[1], [0], [0], [1], [0, 0, 1, 1], [], []>} : vector<8x128xf32>, vector<128x128xf32>, vector<8x128xf32> -> vector<8x128xf32>
    %24 = vector.broadcast %22 : vector<1x128xf32> to vector<8x128xf32>
    %25 = arith.addf %23, %24 : vector<8x128xf32>
    %26 = arith.mulf %0, %25 : vector<8x128xf32>
    %27 = arith.addf %26, %18 : vector<8x128xf32>
    %c0_19 = arith.constant 0 : index
    %c0_20 = arith.constant 0 : index
    %28 = vector.load %arg4[%c0_19, %c0_20] : memref<8x128xf32, #tpu.memory_space<vmem>>, vector<8x128xf32>
    tpu.vector_store %arg4[%c0_19, %c0_20], %27 {strides = array<i32>} : memref<8x128xf32, #tpu.memory_space<vmem>>, vector<8x128xf32>,
    return
  }
  func.func @transform_0(%arg0: i32) -> (i32, i32) {
    %c0_i32 = arith.constant 0 : i32
    %c0_i32_0 = arith.constant 0 : i32
    return %arg0, %c0_i32 : i32, i32
  }
  func.func @transform_1(%arg0: i32) -> (i32, i32, i32) {
    %c0_i32 = arith.constant 0 : i32
    %c0_i32_0 = arith.constant 0 : i32
    %c0_i32_1 = arith.constant 0 : i32
    %c0_i32_2 = arith.constant 0 : i32
    return %c0_i32, %c0_i32_0, %c0_i32_1 : i32, i32, i32
  }
  func.func @transform_2(%arg0: i32) -> (i32, i32, i32) {
    %c0_i32 = arith.constant 0 : i32
    %c0_i32_0 = arith.constant 0 : i32
    %c0_i32_1 = arith.constant 0 : i32
    %c0_i32_2 = arith.constant 0 : i32
    return %c0_i32, %c0_i32_0, %c0_i32_1 : i32, i32, i32
  }
  func.func @transform_3(%arg0: i32) -> (i32, i32) {
    %c0_i32 = arith.constant 0 : i32
    %c0_i32_0 = arith.constant 0 : i32
    return %arg0, %c0_i32 : i32, i32
  }
}

module attributes {stable_mosaic.version = 11 : i64} {
  func.func @_dcnv2_kernel(%arg0: i32, %arg1: memref<8x128xf32, #tpu.memory_space<vmem>>, %arg2: memref<3x128x128xf32, #tpu.memory_space<vmem>>, %arg3: memref<3x1x128xf32, #tpu.memory_space<vmem>>, %arg4: memref<8x128xf32, #tpu.memory_space<vmem>>) attributes {dimension_semantics = [#tpu.dimension_semantics<parallel>], iteration_bounds = array<i64: 1>, scalar_prefetch = 0 : i64, scratch_operands = 0 : i64, tpu.core_type = #tpu.core_type<tc>, window_params = [{transform_indices = @transform_0, window_bounds = array<i64: 8, 128>}, {pipeline_mode = #tpu.pipeline_mode<synchronous>, transform_indices = @transform_1, window_bounds = array<i64: 3, 128, 128>}, {pipeline_mode = #tpu.pipeline_mode<synchronous>, transform_indices = @transform_2, window_bounds = array<i64: 3, 1, 128>}, {transform_indices = @transform_3, window_bounds = array<i64: 8, 128>}]} {
    %c0 = arith.constant 0 : index
    %c0_0 = arith.constant 0 : index
    %0 = vector.load %arg1[%c0, %c0_0] : memref<8x128xf32, #tpu.memory_space<vmem>>, vector<8x128xf32>
    %c0_1 = arith.constant 0 : index
    %c0_2 = arith.constant 0 : index
    %c0_3 = arith.constant 0 : index
    %1 = vector.load %arg2[%c0_1, %c0_2, %c0_3] : memref<3x128x128xf32, #tpu.memory_space<vmem>>, vector<1x128x128xf32>
    %2 = vector.shape_cast %1 : vector<1x128x128xf32> to vector<128x128xf32>
    %c0_4 = arith.constant 0 : index
    %c0_5 = arith.constant 0 : index
    %c0_6 = arith.constant 0 : index
    %3 = vector.load %arg3[%c0_4, %c0_5, %c0_6] : memref<3x1x128xf32, #tpu.memory_space<vmem>>, vector<1x1x128xf32>
    %4 = vector.shape_cast %3 : vector<1x1x128xf32> to vector<1x128xf32>
    %cst = arith.constant dense<0.000000e+00> : vector<8x128xf32>
    %5 = tpu.matmul %0, %2, %cst {dimension_numbers = #tpu.dot_dimension_numbers<[1], [0], [0], [1], [0, 0, 1, 1], [], []>} : vector<8x128xf32>, vector<128x128xf32>, vector<8x128xf32> -> vector<8x128xf32>
    %6 = vector.broadcast %4 : vector<1x128xf32> to vector<8x128xf32>
    %7 = arith.addf %5, %6 : vector<8x128xf32>
    %8 = arith.mulf %0, %7 : vector<8x128xf32>
    %9 = arith.addf %8, %0 : vector<8x128xf32>
    %c1 = arith.constant 1 : index
    %c0_7 = arith.constant 0 : index
    %c0_8 = arith.constant 0 : index
    %10 = vector.load %arg2[%c1, %c0_7, %c0_8] : memref<3x128x128xf32, #tpu.memory_space<vmem>>, vector<1x128x128xf32>
    %11 = vector.shape_cast %10 : vector<1x128x128xf32> to vector<128x128xf32>
    %c1_9 = arith.constant 1 : index
    %c0_10 = arith.constant 0 : index
    %c0_11 = arith.constant 0 : index
    %12 = vector.load %arg3[%c1_9, %c0_10, %c0_11] : memref<3x1x128xf32, #tpu.memory_space<vmem>>, vector<1x1x128xf32>
    %13 = vector.shape_cast %12 : vector<1x1x128xf32> to vector<1x128xf32>
    %cst_12 = arith.constant dense<0.000000e+00> : vector<8x128xf32>
    %14 = tpu.matmul %9, %11, %cst_12 {dimension_numbers = #tpu.dot_dimension_numbers<[1], [0], [0], [1], [0, 0, 1, 1], [], []>} : vector<8x128xf32>, vector<128x128xf32>, vector<8x128xf32> -> vector<8x128xf32>
    %15 = vector.broadcast %13 : vector<1x128xf32> to vector<8x128xf32>
    %16 = arith.addf %14, %15 : vector<8x128xf32>
    %17 = arith.mulf %0, %16 : vector<8x128xf32>
    %18 = arith.addf %17, %9 : vector<8x128xf32>
    %c2 = arith.constant 2 : index
    %c0_13 = arith.constant 0 : index
    %c0_14 = arith.constant 0 : index
    %19 = vector.load %arg2[%c2, %c0_13, %c0_14] : memref<3x128x128xf32, #tpu.memory_space<vmem>>, vector<1x128x128xf32>
    %20 = vector.shape_cast %19 : vector<1x128x128xf32> to vector<128x128xf32>
    %c2_15 = arith.constant 2 : index
    %c0_16 = arith.constant 0 : index
    %c0_17 = arith.constant 0 : index
    %21 = vector.load %arg3[%c2_15, %c0_16, %c0_17] : memref<3x1x128xf32, #tpu.memory_space<vmem>>, vector<1x1x128xf32>
    %22 = vector.shape_cast %21 : vector<1x1x128xf32> to vector<1x128xf32>
    %cst_18 = arith.constant dense<0.000000e+00> : vector<8x128xf32>
    %23 = tpu.matmul %18, %20, %cst_18 {dimension_numbers = #tpu.dot_dimension_numbers<[1], [0], [0], [1], [0, 0, 1, 1], [], []>} : vector<8x128xf32>, vector<128x128xf32>, vector<8x128xf32> -> vector<8x128xf32>
    %24 = vector.broadcast %22 : vector<1x128xf32> to vector<8x128xf32>
    %25 = arith.addf %23, %24 : vector<8x128xf32>
    %26 = arith.mulf %0, %25 : vector<8x128xf32>
    %27 = arith.addf %26, %18 : vector<8x128xf32>
    %c0_19 = arith.constant 0 : index
    %c0_20 = arith.constant 0 : index
    %28 = vector.load %arg4[%c0_19, %c0_20] : memref<8x128xf32, #tpu.memory_space<vmem>>, vector<8x128xf32>
    tpu.vector_store %arg4[%c0_19, %c0_20], %27 {strides = array<i32>} : memref<8x128xf32, #tpu.memory_space<vmem>>, vector<8x128xf32>,
    return
  }
  func.func @transform_0(%arg0: i32) -> (i32, i32) {
    %c0_i32 = arith.constant 0 : i32
    %c0_i32_0 = arith.constant 0 : i32
    return %arg0, %c0_i32 : i32, i32
  }
  func.func @transform_1(%arg0: i32) -> (i32, i32, i32) {
    %c0_i32 = arith.constant 0 : i32
    %c0_i32_0 = arith.constant 0 : i32
    %c0_i32_1 = arith.constant 0 : i32
    %c0_i32_2 = arith.constant 0 : i32
    return %c0_i32, %c0_i32_0, %c0_i32_1 : i32, i32, i32
  }
  func.func @transform_2(%arg0: i32) -> (i32, i32, i32) {
    %c0_i32 = arith.constant 0 : i32
    %c0_i32_0 = arith.constant 0 : i32
    %c0_i32_1 = arith.constant 0 : i32
    %c0_i32_2 = arith.constant 0 : i32
    return %c0_i32, %c0_i32_0, %c0_i32_1 : i32, i32, i32
  }
  func.func @transform_3(%arg0: i32) -> (i32, i32) {
    %c0_i32 = arith.constant 0 : i32
    %c0_i32_0 = arith.constant 0 : i32
    return %arg0, %c0_i32 : i32, i32
  }
}

</mosaic_0001>

<bundles_post_ra>
// kernel: tpu_custom_call.1
= control target key start
LH: loop header
LB: loop body
LE: loop exit
PB: predicated region body
PF: predicated region fallthrough
CT: control target
= control target key end

     0   :  { %8 = vsyncpa [#allocation3], 0  ;;  %s778_s0 = inlined_call_operand.hbm [shape: f32[8,128], index: 0, kind: input, shape index: {}]   ;;  %s779_s1 = inlined_call_operand.hbm [shape: f32[3,128,128], index: 1, kind: input, shape index: {}]   ;;  %s780_s2 = inlined_call_operand.vmem [shape: f32[3,1,128], index: 2, kind: input, shape index: {}]   ;;  %s781_s3 = inlined_call_operand.hbm [shape: f32[8,128], index: 3, kind: output, shape index: {}]  }
   0x1   :  { %9 = vsyncpa [#allocation6], 0 }
   0x2   :  { %10 = vsyncpa [#allocation4], 0  ;;  %s661_s12 = smov [#allocation2]   ;;  %s662_s14 = smov [#allocation5]  }
   0x3   :  { %s17_s13 = sshll.u32 %s661_s12, 4  ;;  %s26_s15 = sshll.u32 %s662_s14, 4  ;;  %s18_s13 = int_to_ptr.vmem [resolvable:$true] %s17_s13  ;;  %s689_s15 = int_to_ptr.vmem [resolvable:$true] %s26_s15 }
   0x4   :  { %s589_s18 = scalar_lea.hbm %s778_s0, 128 }
   0x5   :  { %p590_p0 = scmp.ne.s32.totalorder %s778_s0, %s589_s18  ;;  %p593_p1 = scmp.lt.u32.totalorder %s589_s18, %s778_s0 }
   0x7   :  { %p595_p2 = pnand %p593_p1, %p590_p0 }
   0x9   :  { %598 = shalt.err (!%p595_p2)
}
   0xa   :  { %s599_s23 = scalar_lea.vmem %s18_s13, 128  ;;  %p604_p4 = scmp.lt.s32.totalorder %s18_s13, %s18_s13 }
   0xb   :  { %p600_p3 = scmp.ne.s32.totalorder %s18_s13, %s599_s23  ;;  %p605_p5 = scmp.lt.s32.totalorder %s599_s23, %s599_s23 }
   0xd   :  { %p606_p6 = por %p605_p5, %p604_p4 }
   0xf   :  { %p607_p7 = pnand %p606_p6, %p600_p3 }
  0x11   :  { %610 = shalt.err (!%p607_p7)
}
  0x12   :  { %20 = dma.hbm_to_vmem [thread:$0]  %s778_s0, 128, %s18_s13, [#allocation3]  }
  0x13   :  { %s611_s28 = scalar_lea.hbm %s779_s1, 6144 }
  0x14   :  { %p612_p8 = scmp.ne.s32.totalorder %s779_s1, %s611_s28  ;;  %p615_p9 = scmp.lt.u32.totalorder %s611_s28, %s779_s1 }
  0x16   :  { %p617_p10 = pnand %p615_p9, %p612_p8 }
  0x18   :  { %620 = shalt.err (!%p617_p10)
}
  0x19   :  { %s621_s6 = scalar_lea.vmem %s689_s15, 6144  ;;  %p626_p12 = scmp.lt.s32.totalorder %s689_s15, %s689_s15 }
  0x1a   :  { %p622_p11 = scmp.ne.s32.totalorder %s689_s15, %s621_s6  ;;  %p627_p13 = scmp.lt.s32.totalorder %s621_s6, %s621_s6 }
  0x1c   :  { %p628_p0 = por %p627_p13, %p626_p12 }
  0x1e   :  { %p629_p1 = pnand %p628_p0, %p622_p11 }
  0x20   :  { %632 = shalt.err (!%p629_p1)
}
  0x21   :  { %s663_s0 = smov 128   ;;  %s664_s7 = smov 8  }
  0x22   :  { %32 = dma.hbm_to_vmem [thread:$0]  %s779_s1, 6144, %s689_s15, [#allocation6], %s663_s0, %s663_s0, %s664_s7  }
  0x23   :  { %655 = dma.done.wait [#allocation3], 128  }
  0x24   :  { %656 = vsyncadd [#allocation3], 4294967168 }
  0x25   :  { %657 = dma.done.wait [#allocation6], 6144  }
  0x26   :  { %658 = vsyncadd [#allocation6], 4294961152  ;;  %v665_v0 = vmov 0.0|0.0   ;;  %vm666_vm0 = vmmov 0   ;;  %v667_v1 = vmov 0.0   ;;  %v42_v2 = vld [vmem:[#allocation5] sm:$0xff] }
  0x27   :  { %509 = vmatprep.subr.bf16.mxu0 %v665_v0  ;;  %436 = vmatprep.mubr.msk.f32.mxu0 %vm666_vm0, %v667_v1  ;;  %v43_v3 = vld [vmem:[#allocation5 + $0x8] sm:$0xff]  ;;  %v44_v4 = vld [vmem:[#allocation5 + $0x10] sm:$0xff]  ;;  %v45_v6 = vld [vmem:[#allocation5 + $0x18] sm:$0xff]  ;;  %s668_s15 = smov [#allocation7]  }
  0x28   :  { %533 = vmatprep.subr.bf16.mxu1 %v665_v0  ;;  %471 = vmatprep.mubr.msk.f32.mxu1 %vm666_vm0, %v667_v1  ;;  %v510_v5 = vpack.c.bf16 %v43_v3, %v42_v2  ;;  %v513_v7 = vpack.c.bf16 %v45_v6, %v44_v4  ;;  %v46_v8 = vld [vmem:[#allocation5 + $0x20] sm:$0xff]  ;;  %v47_v9 = vld [vmem:[#allocation5 + $0x28] sm:$0xff]  ;;  %v140_v12 = vld [vmem:[#allocation5 + $0x90] sm:$0xff]  ;;  %s338_s16 = sshll.u32 %s668_s15, 4  ;;  %s339_s16 = int_to_ptr.vmem [resolvable:$true] %s338_s16 }
  0x29   :  { %v138_v10 = vld [vmem:[#allocation5 + $0x80] sm:$0xff]  ;;  %v139_v11 = vld [vmem:[#allocation5 + $0x88] sm:$0xff]  ;;  %v141_v13 = vld [vmem:[#allocation5 + $0x98] sm:$0xff]  ;;  %v516_v14 = vpack.c.bf16 %v47_v9, %v46_v8  ;;  %s633_s17 = scalar_lea.vmem %s339_s16, 128  ;;  %p638_p3 = scmp.lt.s32.totalorder %s339_s16, %s339_s16 }
  0x2a   :  { %511 = vmatpush3.bf16.msra.mxu0 %v510_v5  ;;  %v534_v15 = vpack.c.bf16 %v139_v11, %v138_v10  ;;  %v48_v16 = vld [vmem:[#allocation5 + $0x30] sm:$0xff]  ;;  %v49_v17 = vld [vmem:[#allocation5 + $0x38] sm:$0xff]  ;;  %v537_v18 = vpack.c.bf16 %v141_v13, %v140_v12  ;;  %v142_v19 = vld [vmem:[#allocation5 + $0xa0] sm:$0xff]  ;;  %p634_p2 = scmp.ne.s32.totalorder %s339_s16, %s633_s17  ;;  %p639_p4 = scmp.lt.s32.totalorder %s633_s17, %s633_s17 }
  0x2b   :  { %512 = vmatprep.subr.bf16.mxu0 %v665_v0  ;;  %v143_v20 = vld [vmem:[#allocation5 + $0xa8] sm:$0xff]  ;;  %v519_v21 = vpack.c.bf16 %v49_v17, %v48_v16  ;;  %v50_v22 = vld [vmem:[#allocation5 + $0x40] sm:$0xff]  ;;  %v144_v25 = vld [vmem:[#allocation5 + $0xb0] sm:$0xff] }
  0x2c   :  { %535 = vmatpush3.bf16.msra.mxu1 %v534_v15  ;;  %v51_v23 = vld [vmem:[#allocation5 + $0x48] sm:$0xff]  ;;  %v540_v24 = vpack.c.bf16 %v143_v20, %v142_v19  ;;  %v145_v26 = vld [vmem:[#allocation5 + $0xb8] sm:$0xff]  ;;  %v52_v28 = vld [vmem:[#allocation5 + $0x50] sm:$0xff]  ;;  %p640_p5 = por %p639_p4, %p638_p3 }
  0x2d   :  { %536 = vmatprep.subr.bf16.mxu1 %v665_v0  ;;  %v522_v27 = vpack.c.bf16 %v51_v23, %v50_v22  ;;  %v53_v29 = vld [vmem:[#allocation5 + $0x58] sm:$0xff]  ;;  %v543_v30 = vpack.c.bf16 %v145_v26, %v144_v25  ;;  %v146_v31 = vld [vmem:[#allocation5 + $0xc0] sm:$0xff]  ;;  %v147_v32 = vld [vmem:[#allocation5 + $0xc8] sm:$0xff] }
  0x2e   :  { %514 = vmatpush3.bf16.msra.mxu0 %v513_v7  ;;  %v525_v33 = vpack.c.bf16 %v53_v29, %v52_v28  ;;  %v54_v34 = vld [vmem:[#allocation5 + $0x60] sm:$0xff]  ;;  %v55_v35 = vld [vmem:[#allocation5 + $0x68] sm:$0xff]  ;;  %v546_v36 = vpack.c.bf16 %v147_v32, %v146_v31  ;;  %v148_v37 = vld [vmem:[#allocation5 + $0xd0] sm:$0xff]  ;;  %p641_p6 = pnand %p640_p5, %p634_p2 }
  0x2f   :  { %515 = vmatprep.subr.bf16.mxu0 %v665_v0  ;;  %v149_v38 = vld [vmem:[#allocation5 + $0xd8] sm:$0xff]  ;;  %v528_v39 = vpack.c.bf16 %v55_v35, %v54_v34  ;;  %v56_v40 = vld [vmem:[#allocation5 + $0x70] sm:$0xff]  ;;  %v150_v45 = vld [vmem:[#allocation5 + $0xe0] sm:$0xff] }
  0x30   :  { %538 = vmatpush3.bf16.msra.mxu1 %v537_v18  ;;  %v57_v41 = vld [vmem:[#allocation5 + $0x78] sm:$0xff]  ;;  %v549_v42 = vpack.c.bf16 %v149_v38, %v148_v37  ;;  %v151_v46 = vld [vmem:[#allocation5 + $0xe8] sm:$0xff]  ;;  %v152_v48 = vld [vmem:[#allocation5 + $0xf0] sm:$0xff] }
  0x31   :  { %539 = vmatprep.subr.bf16.mxu1 %v665_v0  ;;  %v531_v43 = vpack.c.bf16 %v57_v41, %v56_v40  ;;  %v739_v44 = vld [vmem:[#allocation2] sm:$0xff]  ;;  %v552_v47 = vpack.c.bf16 %v151_v46, %v150_v45  ;;  %v235_v51 = vld [vmem:[#allocation5 + $0x100] sm:$0xff]  ;;  %v236_v52 = vld [vmem:[#allocation5 + $0x108] sm:$0xff] }
  0x32   :  { %517 = vmatpush3.bf16.msra.mxu0 %v516_v14  ;;  %v153_v49 = vld [vmem:[#allocation5 + $0xf8] sm:$0xff]  ;;  %v237_v53 = vld [vmem:[#allocation5 + $0x110] sm:$0xff]  ;;  %v558_v54 = vpack.c.bf16 %v236_v52, %v235_v51  ;;  %v239_v57 = vld [vmem:[#allocation5 + $0x120] sm:$0xff] }
  0x33   :  { %518 = vmatprep.subr.bf16.mxu0 %v665_v0  ;;  %v555_v50 = vpack.c.bf16 %v153_v49, %v152_v48  ;;  %v238_v55 = vld [vmem:[#allocation5 + $0x118] sm:$0xff]  ;;  %v240_v58 = vld [vmem:[#allocation5 + $0x128] sm:$0xff]  ;;  %v241_v60 = vld [vmem:[#allocation5 + $0x130] sm:$0xff] }
  0x34   :  { %541 = vmatpush3.bf16.msra.mxu1 %v540_v24  ;;  %v561_v56 = vpack.c.bf16 %v238_v55, %v237_v53  ;;  %v564_v59 = vpack.c.bf16 %v240_v58, %v239_v57  ;;  %v242_v61 = vld [vmem:[#allocation5 + $0x138] sm:$0xff]  ;;  %v243_v63 = vld [vmem:[#allocation5 + $0x140] sm:$0xff]  ;;  %v245_v3 = vld [vmem:[#allocation5 + $0x150] sm:$0xff] }
  0x35   :  { %542 = vmatprep.subr.bf16.mxu1 %v665_v0  ;;  %v567_v62 = vpack.c.bf16 %v242_v61, %v241_v60  ;;  %v246_v4 = vld [vmem:[#allocation5 + $0x158] sm:$0xff]  ;;  %v247_v12 = vld [vmem:[#allocation5 + $0x160] sm:$0xff]  ;;  %v248_v13 = vld [vmem:[#allocation5 + $0x168] sm:$0xff] }
  0x36   :  { %520 = vmatpush3.bf16.msra.mxu0 %v519_v21  ;;  %v573_v5 = vpack.c.bf16 %v246_v4, %v245_v3  ;;  %v348_v6 = vld [vmem:[%s780_s2] ss:$0 sm:$0xff]  ;;  %v576_v14 = vpack.c.bf16 %v248_v13, %v247_v12  ;;  %v249_v15 = vld [vmem:[#allocation5 + $0x170] sm:$0xff]  ;;  %v350_v18 = vld [vmem:[%s780_s2 + $0x1] ss:$0 sm:$0xff] }
  0x37   :  { %521 = vmatprep.subr.bf16.mxu0 %v665_v0  ;;  %v250_v16 = vld [vmem:[#allocation5 + $0x178] sm:$0xff] }
  0x38   :  { %544 = vmatpush3.bf16.msra.mxu1 %v543_v30  ;;  %v579_v17 = vpack.c.bf16 %v250_v16, %v249_v15  ;;  %v352_v24 = vld [vmem:[%s780_s2 + $0x2] ss:$0 sm:$0xff] }
  0x39   :  { %545 = vmatprep.subr.bf16.mxu1 %v665_v0 }
  0x3a   :  { %523 = vmatpush3.bf16.msra.mxu0 %v522_v27 }
  0x3b   :  { %524 = vmatprep.subr.bf16.mxu0 %v665_v0 }
  0x3c   :  { %547 = vmatpush3.bf16.msra.mxu1 %v546_v36 }
  0x3d   :  { %548 = vmatprep.subr.bf16.mxu1 %v665_v0 }
  0x3e   :  { %526 = vmatpush3.bf16.msra.mxu0 %v525_v33 }
  0x3f   :  { %527 = vmatprep.subr.bf16.mxu0 %v665_v0 }
  0x40   :  { %550 = vmatpush3.bf16.msra.mxu1 %v549_v42 }
  0x41   :  { %551 = vmatprep.subr.bf16.mxu1 %v665_v0 }
  0x42   :  { %529 = vmatpush3.bf16.msra.mxu0 %v528_v39 }
  0x43   :  { %530 = vmatprep.subr.bf16.mxu0 %v665_v0 }
  0x44   :  { %553 = vmatpush3.bf16.msra.mxu1 %v552_v47 }
  0x45   :  { %554 = vmatprep.subr.bf16.mxu1 %v665_v0 }
  0x46   :  { %532 = vmatpush3.bf16.msra.mxu0 %v531_v43 }
  0x47   :  { %557 = vmatprep.subr.bf16.mxu0 %v665_v0 }
  0x48   :  { %556 = vmatpush3.bf16.msra.mxu1 %v555_v50 }
  0x49   :  { %437 = vmatmul.mubr.f32.vlgmr.msra.gmra.mrb[0].mxu0 %v739_v44 }
  0x4a   :  { %506 = vmatprep.mubr.msk.f32.mxu0 %vm666_vm0, %v667_v1  ;;  %559 = vmatpush3.bf16.msra.mxu0 %v558_v54  ;;  %v244_v1 = vld [vmem:[#allocation5 + $0x148] sm:$0xff] }
  0x4b   :  { %560 = vmatprep.subr.bf16.mxu0 %v665_v0  ;;  %v570_v2 = vpack.c.bf16 %v244_v1, %v243_v63 }
  0x4e   :  { %562 = vmatpush3.bf16.msra.mxu0 %v561_v56 }
  0x4f   :  { %563 = vmatprep.subr.bf16.mxu0 %v665_v0 }
  0x52   :  { %565 = vmatpush3.bf16.msra.mxu0 %v564_v59 }
  0x53   :  { %566 = vmatprep.subr.bf16.mxu0 %v665_v0 }
  0x56   :  { %568 = vmatpush3.bf16.msra.mxu0 %v567_v62 }
  0x57   :  { %569 = vmatprep.subr.bf16.mxu0 %v665_v0 }
  0x5a   :  { %571 = vmatpush3.bf16.msra.mxu0 %v570_v2 }
  0x5b   :  { %572 = vmatprep.subr.bf16.mxu0 %v665_v0 }
  0x5e   :  { %574 = vmatpush3.bf16.msra.mxu0 %v573_v5 }
  0x5f   :  { %575 = vmatprep.subr.bf16.mxu0 %v665_v0 }
  0x62   :  { %577 = vmatpush3.bf16.msra.mxu0 %v576_v14 }
  0x63   :  { %578 = vmatprep.subr.bf16.mxu0 %v665_v0 }
  0x66   :  { %580 = vmatpush3.bf16.msra.mxu0 %v579_v17 }
 0x11c   :  { %v131_v7 = vpop.f32.mrb[0].mxu0 }
 0x11d   :  { %v132_v8 = vadd.f32 %v348_v6, %v131_v7  ;;  %v438_v9 = vpop.f32.mrb[1].mxu0 }
 0x11f   :  { %v135_v10 = vmul.f32 %v132_v8, %v739_v44 }
 0x121   :  { %v136_v11 = vadd.f32 %v135_v10, %v739_v44 }
 0x123   :  { %472 = vmatmul.mubr.f32.vlgmr.msra.gmra.mrb[0].mxu1 %v136_v11 }
 0x1f6   :  { %v228_v19 = vpop.f32.mrb[0].mxu1 }
 0x1f7   :  { %v229_v20 = vadd.f32 %v350_v18, %v228_v19  ;;  %v473_v21 = vpop.f32.mrb[1].mxu1 }
 0x1f9   :  { %v232_v22 = vmul.f32 %v229_v20, %v739_v44 }
 0x1fb   :  { %v233_v23 = vadd.f32 %v232_v22, %v136_v11 }
 0x1fd   :  { %507 = vmatmul.mubr.f32.vlgmr.msra.gmra.mrb[2].mxu0 %v233_v23 }
 0x2d0   :  { %v325_v0 = vpop.f32.mrb[2].mxu0 }
 0x2d1   :  { %v326_v25 = vadd.f32 %v352_v24, %v325_v0  ;;  %v508_v26 = vpop.f32.mrb[3].mxu0 }
 0x2d3   :  { %v329_v27 = vmul.f32 %v326_v25, %v739_v44 }
 0x2d5   :  { %v330_v28 = vadd.f32 %v329_v27, %v233_v23 }
 0x2d7   :  { %331 = vst [vmem:[#allocation7] sm:$0xff] %v330_v28 }
 0x2d8   :  { %644 = shalt.err (!%p641_p6)
}
 0x2d9   :  { %s645_s2 = scalar_lea.hbm %s781_s3, 128 }
 0x2da   :  { %p646_p7 = scmp.ne.s32.totalorder %s781_s3, %s645_s2  ;;  %p649_p8 = scmp.lt.u32.totalorder %s645_s2, %s781_s3 }
 0x2dc   :  { %p651_p9 = pnand %p649_p8, %p646_p7 }
 0x2de   :  { %654 = shalt.err (!%p651_p9)
}
 0x2df   :  { %341 = dma.vmem_to_hbm [thread:$0]  %s339_s16, 128, %s781_s3, [#allocation4]  }
 0x2e0   :  { %659 = dma.done.wait [#allocation4], 128  }
 0x2e1   :  { %660 = vsyncadd [#allocation4], 4294967168 }
 0x2e2   :  { %345 = vsyncpa [#allocation3], 1 }
 0x2e3   :  { %346 = vsyncpa [#allocation6], 1 }
 0x2e4   :  { %347 = vsyncpa [#allocation4], 1 }

// kernel: tpu_custom_call.1
= control target key start
LH: loop header
LB: loop body
LE: loop exit
PB: predicated region body
PF: predicated region fallthrough
CT: control target
= control target key end

     0   :  { %8 = vsyncpa [#allocation3], 0  ;;  %s778_s0 = inlined_call_operand.hbm [shape: f32[8,128], index: 0, kind: input, shape index: {}]   ;;  %s779_s1 = inlined_call_operand.hbm [shape: f32[3,128,128], index: 1, kind: input, shape index: {}]   ;;  %s780_s2 = inlined_call_operand.vmem [shape: f32[3,1,128], index: 2, kind: input, shape index: {}]   ;;  %s781_s3 = inlined_call_operand.hbm [shape: f32[8,128], index: 3, kind: output, shape index: {}]  }
   0x1   :  { %9 = vsyncpa [#allocation6], 0 }
   0x2   :  { %10 = vsyncpa [#allocation4], 0  ;;  %s661_s12 = smov [#allocation2]   ;;  %s662_s14 = smov [#allocation5]  }
   0x3   :  { %s17_s13 = sshll.u32 %s661_s12, 4  ;;  %s26_s15 = sshll.u32 %s662_s14, 4  ;;  %s18_s13 = int_to_ptr.vmem [resolvable:$true] %s17_s13  ;;  %s689_s15 = int_to_ptr.vmem [resolvable:$true] %s26_s15 }
   0x4   :  { %s589_s18 = scalar_lea.hbm %s778_s0, 128 }
   0x5   :  { %p590_p0 = scmp.ne.s32.totalorder %s778_s0, %s589_s18  ;;  %p593_p1 = scmp.lt.u32.totalorder %s589_s18, %s778_s0 }
   0x7   :  { %p595_p2 = pnand %p593_p1, %p590_p0 }
   0x9   :  { %598 = shalt.err (!%p595_p2)
}
   0xa   :  { %s599_s23 = scalar_lea.vmem %s18_s13, 128  ;;  %p604_p4 = scmp.lt.s32.totalorder %s18_s13, %s18_s13 }
   0xb   :  { %p600_p3 = scmp.ne.s32.totalorder %s18_s13, %s599_s23  ;;  %p605_p5 = scmp.lt.s32.totalorder %s599_s23, %s599_s23 }
   0xd   :  { %p606_p6 = por %p605_p5, %p604_p4 }
   0xf   :  { %p607_p7 = pnand %p606_p6, %p600_p3 }
  0x11   :  { %610 = shalt.err (!%p607_p7)
}
  0x12   :  { %20 = dma.hbm_to_vmem [thread:$0]  %s778_s0, 128, %s18_s13, [#allocation3]  }
  0x13   :  { %s611_s28 = scalar_lea.hbm %s779_s1, 6144 }
  0x14   :  { %p612_p8 = scmp.ne.s32.totalorder %s779_s1, %s611_s28  ;;  %p615_p9 = scmp.lt.u32.totalorder %s611_s28, %s779_s1 }
  0x16   :  { %p617_p10 = pnand %p615_p9, %p612_p8 }
  0x18   :  { %620 = shalt.err (!%p617_p10)
}
  0x19   :  { %s621_s6 = scalar_lea.vmem %s689_s15, 6144  ;;  %p626_p12 = scmp.lt.s32.totalorder %s689_s15, %s689_s15 }
  0x1a   :  { %p622_p11 = scmp.ne.s32.totalorder %s689_s15, %s621_s6  ;;  %p627_p13 = scmp.lt.s32.totalorder %s621_s6, %s621_s6 }
  0x1c   :  { %p628_p0 = por %p627_p13, %p626_p12 }
  0x1e   :  { %p629_p1 = pnand %p628_p0, %p622_p11 }
  0x20   :  { %632 = shalt.err (!%p629_p1)
}
  0x21   :  { %s663_s0 = smov 128   ;;  %s664_s7 = smov 8  }
  0x22   :  { %32 = dma.hbm_to_vmem [thread:$0]  %s779_s1, 6144, %s689_s15, [#allocation6], %s663_s0, %s663_s0, %s664_s7  }
  0x23   :  { %655 = dma.done.wait [#allocation3], 128  }
  0x24   :  { %656 = vsyncadd [#allocation3], 4294967168 }
  0x25   :  { %657 = dma.done.wait [#allocation6], 6144  }
  0x26   :  { %658 = vsyncadd [#allocation6], 4294961152  ;;  %v665_v0 = vmov 0.0|0.0   ;;  %vm666_vm0 = vmmov 0   ;;  %v667_v1 = vmov 0.0   ;;  %v42_v2 = vld [vmem:[#allocation5] sm:$0xff] }
  0x27   :  { %509 = vmatprep.subr.bf16.mxu0 %v665_v0  ;;  %436 = vmatprep.mubr.msk.f32.mxu0 %vm666_vm0, %v667_v1  ;;  %v43_v3 = vld [vmem:[#allocation5 + $0x8] sm:$0xff]  ;;  %v44_v4 = vld [vmem:[#allocation5 + $0x10] sm:$0xff]  ;;  %v45_v6 = vld [vmem:[#allocation5 + $0x18] sm:$0xff]  ;;  %s668_s15 = smov [#allocation7]  }
  0x28   :  { %533 = vmatprep.subr.bf16.mxu1 %v665_v0  ;;  %471 = vmatprep.mubr.msk.f32.mxu1 %vm666_vm0, %v667_v1  ;;  %v510_v5 = vpack.c.bf16 %v43_v3, %v42_v2  ;;  %v513_v7 = vpack.c.bf16 %v45_v6, %v44_v4  ;;  %v46_v8 = vld [vmem:[#allocation5 + $0x20] sm:$0xff]  ;;  %v47_v9 = vld [vmem:[#allocation5 + $0x28] sm:$0xff]  ;;  %v140_v12 = vld [vmem:[#allocation5 + $0x90] sm:$0xff]  ;;  %s338_s16 = sshll.u32 %s668_s15, 4  ;;  %s339_s16 = int_to_ptr.vmem [resolvable:$true] %s338_s16 }
  0x29   :  { %v138_v10 = vld [vmem:[#allocation5 + $0x80] sm:$0xff]  ;;  %v139_v11 = vld [vmem:[#allocation5 + $0x88] sm:$0xff]  ;;  %v141_v13 = vld [vmem:[#allocation5 + $0x98] sm:$0xff]  ;;  %v516_v14 = vpack.c.bf16 %v47_v9, %v46_v8  ;;  %s633_s17 = scalar_lea.vmem %s339_s16, 128  ;;  %p638_p3 = scmp.lt.s32.totalorder %s339_s16, %s339_s16 }
  0x2a   :  { %511 = vmatpush3.bf16.msra.mxu0 %v510_v5  ;;  %v534_v15 = vpack.c.bf16 %v139_v11, %v138_v10  ;;  %v48_v16 = vld [vmem:[#allocation5 + $0x30] sm:$0xff]  ;;  %v49_v17 = vld [vmem:[#allocation5 + $0x38] sm:$0xff]  ;;  %v537_v18 = vpack.c.bf16 %v141_v13, %v140_v12  ;;  %v142_v19 = vld [vmem:[#allocation5 + $0xa0] sm:$0xff]  ;;  %p634_p2 = scmp.ne.s32.totalorder %s339_s16, %s633_s17  ;;  %p639_p4 = scmp.lt.s32.totalorder %s633_s17, %s633_s17 }
  0x2b   :  { %512 = vmatprep.subr.bf16.mxu0 %v665_v0  ;;  %v143_v20 = vld [vmem:[#allocation5 + $0xa8] sm:$0xff]  ;;  %v519_v21 = vpack.c.bf16 %v49_v17, %v48_v16  ;;  %v50_v22 = vld [vmem:[#allocation5 + $0x40] sm:$0xff]  ;;  %v144_v25 = vld [vmem:[#allocation5 + $0xb0] sm:$0xff] }
  0x2c   :  { %535 = vmatpush3.bf16.msra.mxu1 %v534_v15  ;;  %v51_v23 = vld [vmem:[#allocation5 + $0x48] sm:$0xff]  ;;  %v540_v24 = vpack.c.bf16 %v143_v20, %v142_v19  ;;  %v145_v26 = vld [vmem:[#allocation5 + $0xb8] sm:$0xff]  ;;  %v52_v28 = vld [vmem:[#allocation5 + $0x50] sm:$0xff]  ;;  %p640_p5 = por %p639_p4, %p638_p3 }
  0x2d   :  { %536 = vmatprep.subr.bf16.mxu1 %v665_v0  ;;  %v522_v27 = vpack.c.bf16 %v51_v23, %v50_v22  ;;  %v53_v29 = vld [vmem:[#allocation5 + $0x58] sm:$0xff]  ;;  %v543_v30 = vpack.c.bf16 %v145_v26, %v144_v25  ;;  %v146_v31 = vld [vmem:[#allocation5 + $0xc0] sm:$0xff]  ;;  %v147_v32 = vld [vmem:[#allocation5 + $0xc8] sm:$0xff] }
  0x2e   :  { %514 = vmatpush3.bf16.msra.mxu0 %v513_v7  ;;  %v525_v33 = vpack.c.bf16 %v53_v29, %v52_v28  ;;  %v54_v34 = vld [vmem:[#allocation5 + $0x60] sm:$0xff]  ;;  %v55_v35 = vld [vmem:[#allocation5 + $0x68] sm:$0xff]  ;;  %v546_v36 = vpack.c.bf16 %v147_v32, %v146_v31  ;;  %v148_v37 = vld [vmem:[#allocation5 + $0xd0] sm:$0xff]  ;;  %p641_p6 = pnand %p640_p5, %p634_p2 }
  0x2f   :  { %515 = vmatprep.subr.bf16.mxu0 %v665_v0  ;;  %v149_v38 = vld [vmem:[#allocation5 + $0xd8] sm:$0xff]  ;;  %v528_v39 = vpack.c.bf16 %v55_v35, %v54_v34  ;;  %v56_v40 = vld [vmem:[#allocation5 + $0x70] sm:$0xff]  ;;  %v150_v45 = vld [vmem:[#allocation5 + $0xe0] sm:$0xff] }
  0x30   :  { %538 = vmatpush3.bf16.msra.mxu1 %v537_v18  ;;  %v57_v41 = vld [vmem:[#allocation5 + $0x78] sm:$0xff]  ;;  %v549_v42 = vpack.c.bf16 %v149_v38, %v148_v37  ;;  %v151_v46 = vld [vmem:[#allocation5 + $0xe8] sm:$0xff]  ;;  %v152_v48 = vld [vmem:[#allocation5 + $0xf0] sm:$0xff] }
  0x31   :  { %539 = vmatprep.subr.bf16.mxu1 %v665_v0  ;;  %v531_v43 = vpack.c.bf16 %v57_v41, %v56_v40  ;;  %v739_v44 = vld [vmem:[#allocation2] sm:$0xff]  ;;  %v552_v47 = vpack.c.bf16 %v151_v46, %v150_v45  ;;  %v235_v51 = vld [vmem:[#allocation5 + $0x100] sm:$0xff]  ;;  %v236_v52 = vld [vmem:[#allocation5 + $0x108] sm:$0xff] }
  0x32   :  { %517 = vmatpush3.bf16.msra.mxu0 %v516_v14  ;;  %v153_v49 = vld [vmem:[#allocation5 + $0xf8] sm:$0xff]  ;;  %v237_v53 = vld [vmem:[#allocation5 + $0x110] sm:$0xff]  ;;  %v558_v54 = vpack.c.bf16 %v236_v52, %v235_v51  ;;  %v239_v57 = vld [vmem:[#allocation5 + $0x120] sm:$0xff] }
  0x33   :  { %518 = vmatprep.subr.bf16.mxu0 %v665_v0  ;;  %v555_v50 = vpack.c.bf16 %v153_v49, %v152_v48  ;;  %v238_v55 = vld [vmem:[#allocation5 + $0x118] sm:$0xff]  ;;  %v240_v58 = vld [vmem:[#allocation5 + $0x128] sm:$0xff]  ;;  %v241_v60 = vld [vmem:[#allocation5 + $0x130] sm:$0xff] }
  0x34   :  { %541 = vmatpush3.bf16.msra.mxu1 %v540_v24  ;;  %v561_v56 = vpack.c.bf16 %v238_v55, %v237_v53  ;;  %v564_v59 = vpack.c.bf16 %v240_v58, %v239_v57  ;;  %v242_v61 = vld [vmem:[#allocation5 + $0x138] sm:$0xff]  ;;  %v243_v63 = vld [vmem:[#allocation5 + $0x140] sm:$0xff]  ;;  %v245_v3 = vld [vmem:[#allocation5 + $0x150] sm:$0xff] }
  0x35   :  { %542 = vmatprep.subr.bf16.mxu1 %v665_v0  ;;  %v567_v62 = vpack.c.bf16 %v242_v61, %v241_v60  ;;  %v246_v4 = vld [vmem:[#allocation5 + $0x158] sm:$0xff]  ;;  %v247_v12 = vld [vmem:[#allocation5 + $0x160] sm:$0xff]  ;;  %v248_v13 = vld [vmem:[#allocation5 + $0x168] sm:$0xff] }
  0x36   :  { %520 = vmatpush3.bf16.msra.mxu0 %v519_v21  ;;  %v573_v5 = vpack.c.bf16 %v246_v4, %v245_v3  ;;  %v348_v6 = vld [vmem:[%s780_s2] ss:$0 sm:$0xff]  ;;  %v576_v14 = vpack.c.bf16 %v248_v13, %v247_v12  ;;  %v249_v15 = vld [vmem:[#allocation5 + $0x170] sm:$0xff]  ;;  %v350_v18 = vld [vmem:[%s780_s2 + $0x1] ss:$0 sm:$0xff] }
  0x37   :  { %521 = vmatprep.subr.bf16.mxu0 %v665_v0  ;;  %v250_v16 = vld [vmem:[#allocation5 + $0x178] sm:$0xff] }
  0x38   :  { %544 = vmatpush3.bf16.msra.mxu1 %v543_v30  ;;  %v579_v17 = vpack.c.bf16 %v250_v16, %v249_v15  ;;  %v352_v24 = vld [vmem:[%s780_s2 + $0x2] ss:$0 sm:$0xff] }
  0x39   :  { %545 = vmatprep.subr.bf16.mxu1 %v665_v0 }
  0x3a   :  { %523 = vmatpush3.bf16.msra.mxu0 %v522_v27 }
  0x3b   :  { %524 = vmatprep.subr.bf16.mxu0 %v665_v0 }
  0x3c   :  { %547 = vmatpush3.bf16.msra.mxu1 %v546_v36 }
  0x3d   :  { %548 = vmatprep.subr.bf16.mxu1 %v665_v0 }
  0x3e   :  { %526 = vmatpush3.bf16.msra.mxu0 %v525_v33 }
  0x3f   :  { %527 = vmatprep.subr.bf16.mxu0 %v665_v0 }
  0x40   :  { %550 = vmatpush3.bf16.msra.mxu1 %v549_v42 }
  0x41   :  { %551 = vmatprep.subr.bf16.mxu1 %v665_v0 }
  0x42   :  { %529 = vmatpush3.bf16.msra.mxu0 %v528_v39 }
  0x43   :  { %530 = vmatprep.subr.bf16.mxu0 %v665_v0 }
  0x44   :  { %553 = vmatpush3.bf16.msra.mxu1 %v552_v47 }
  0x45   :  { %554 = vmatprep.subr.bf16.mxu1 %v665_v0 }
  0x46   :  { %532 = vmatpush3.bf16.msra.mxu0 %v531_v43 }
  0x47   :  { %557 = vmatprep.subr.bf16.mxu0 %v665_v0 }
  0x48   :  { %556 = vmatpush3.bf16.msra.mxu1 %v555_v50 }
  0x49   :  { %437 = vmatmul.mubr.f32.vlgmr.msra.gmra.mrb[0].mxu0 %v739_v44 }
  0x4a   :  { %506 = vmatprep.mubr.msk.f32.mxu0 %vm666_vm0, %v667_v1  ;;  %559 = vmatpush3.bf16.msra.mxu0 %v558_v54  ;;  %v244_v1 = vld [vmem:[#allocation5 + $0x148] sm:$0xff] }
  0x4b   :  { %560 = vmatprep.subr.bf16.mxu0 %v665_v0  ;;  %v570_v2 = vpack.c.bf16 %v244_v1, %v243_v63 }
  0x4e   :  { %562 = vmatpush3.bf16.msra.mxu0 %v561_v56 }
  0x4f   :  { %563 = vmatprep.subr.bf16.mxu0 %v665_v0 }
  0x52   :  { %565 = vmatpush3.bf16.msra.mxu0 %v564_v59 }
  0x53   :  { %566 = vmatprep.subr.bf16.mxu0 %v665_v0 }
  0x56   :  { %568 = vmatpush3.bf16.msra.mxu0 %v567_v62 }
  0x57   :  { %569 = vmatprep.subr.bf16.mxu0 %v665_v0 }
  0x5a   :  { %571 = vmatpush3.bf16.msra.mxu0 %v570_v2 }
  0x5b   :  { %572 = vmatprep.subr.bf16.mxu0 %v665_v0 }
  0x5e   :  { %574 = vmatpush3.bf16.msra.mxu0 %v573_v5 }
  0x5f   :  { %575 = vmatprep.subr.bf16.mxu0 %v665_v0 }
  0x62   :  { %577 = vmatpush3.bf16.msra.mxu0 %v576_v14 }
  0x63   :  { %578 = vmatprep.subr.bf16.mxu0 %v665_v0 }
  0x66   :  { %580 = vmatpush3.bf16.msra.mxu0 %v579_v17 }
 0x11c   :  { %v131_v7 = vpop.f32.mrb[0].mxu0 }
 0x11d   :  { %v132_v8 = vadd.f32 %v348_v6, %v131_v7  ;;  %v438_v9 = vpop.f32.mrb[1].mxu0 }
 0x11f   :  { %v135_v10 = vmul.f32 %v132_v8, %v739_v44 }
 0x121   :  { %v136_v11 = vadd.f32 %v135_v10, %v739_v44 }
 0x123   :  { %472 = vmatmul.mubr.f32.vlgmr.msra.gmra.mrb[0].mxu1 %v136_v11 }
 0x1f6   :  { %v228_v19 = vpop.f32.mrb[0].mxu1 }
 0x1f7   :  { %v229_v20 = vadd.f32 %v350_v18, %v228_v19  ;;  %v473_v21 = vpop.f32.mrb[1].mxu1 }
 0x1f9   :  { %v232_v22 = vmul.f32 %v229_v20, %v739_v44 }
 0x1fb   :  { %v233_v23 = vadd.f32 %v232_v22, %v136_v11 }
 0x1fd   :  { %507 = vmatmul.mubr.f32.vlgmr.msra.gmra.mrb[2].mxu0 %v233_v23 }
 0x2d0   :  { %v325_v0 = vpop.f32.mrb[2].mxu0 }
 0x2d1   :  { %v326_v25 = vadd.f32 %v352_v24, %v325_v0  ;;  %v508_v26 = vpop.f32.mrb[3].mxu0 }
 0x2d3   :  { %v329_v27 = vmul.f32 %v326_v25, %v739_v44 }
 0x2d5   :  { %v330_v28 = vadd.f32 %v329_v27, %v233_v23 }
 0x2d7   :  { %331 = vst [vmem:[#allocation7] sm:$0xff] %v330_v28 }
 0x2d8   :  { %644 = shalt.err (!%p641_p6)
}
 0x2d9   :  { %s645_s2 = scalar_lea.hbm %s781_s3, 128 }
 0x2da   :  { %p646_p7 = scmp.ne.s32.totalorder %s781_s3, %s645_s2  ;;  %p649_p8 = scmp.lt.u32.totalorder %s645_s2, %s781_s3 }
 0x2dc   :  { %p651_p9 = pnand %p649_p8, %p646_p7 }
 0x2de   :  { %654 = shalt.err (!%p651_p9)
}
 0x2df   :  { %341 = dma.vmem_to_hbm [thread:$0]  %s339_s16, 128, %s781_s3, [#allocation4]  }
 0x2e0   :  { %659 = dma.done.wait [#allocation4], 128  }
 0x2e1   :  { %660 = vsyncadd [#allocation4], 4294967168 }
 0x2e2   :  { %345 = vsyncpa [#allocation3], 1 }
 0x2e3   :  { %346 = vsyncpa [#allocation6], 1 }
 0x2e4   :  { %347 = vsyncpa [#allocation4], 1 }

</bundles_post_ra>
